<compile_context>
chip_gen: v7x
topology: tpu7x:2x2x1
jax: 0.10.0
libtpu: 0.0.40
codegen_flags: <defaults>
</compile_context>

<pallas_src>
import jax
import jax.numpy as jnp
from jax.experimental import pallas as pl
from jax.experimental.pallas import tpu as pltpu


def _round_up(x, m):
    return -(-x // m) * m


def _actor_critic_kernel(x_ref, w1_ref, b1_ref, w2_ref, b2_ref,
                         wh_ref, bh_ref, out_ref):
    """Fused ActorCritics forward for one batch tile (3 MXU passes)."""
    # ---- Layer 1 (fused pi1 | v1): one MXU pass -> [TB, 256] ----
    x = x_ref[...].astype(jnp.bfloat16)
    y1 = jnp.dot(x, w1_ref[...], preferred_element_type=jnp.float32)
    y1 = jnp.maximum(y1 + b1_ref[...], 0.0)

    # ---- Layer 2: block-diagonal shared pi2 -> [TB, 128] (lane dense) ----
    #   cols  0: 64 = relu(pi2(pi1))
    #   cols 64:128 = relu(pi2(v1))   (torch forward reuses pi2; v2 is dead)
    h2 = jnp.dot(y1.astype(jnp.bfloat16), w2_ref[...],
                 preferred_element_type=jnp.float32)
    h2 = jnp.maximum(h2 + b2_ref[...], 0.0)

    # ---- Heads: block-diagonal (pi | v) -> [TB, n_actions + 1] ----
    out = jnp.dot(h2.astype(jnp.bfloat16), wh_ref[...],
                  preferred_element_type=jnp.float32)
    out_ref[...] = out + bh_ref[...]


def prepare_params(params):
    """One-time packing of torch-layout weights into the fused/block-diagonal
    layout the kernel consumes. Call once, reuse on every forward."""
    n_actions = params["w_pi"].shape[1]
    head_out = n_actions + 1

    # Layer 1: pi1 | v1 along the output axis -> [D, 256].
    w1 = jnp.concatenate([params["w_pi1"], params["w_v1"]],
                         axis=1).astype(jnp.bfloat16)
    b1 = jnp.concatenate([params["b_pi1"], params["b_v1"]], axis=1)      # [1,256]

    # Layer 2: blockdiag(pi2, pi2) -> [256, 128]; both branches share pi2.
    w2 = params["w_pi2"]                                                 # [128,64]
    z = jnp.zeros_like(w2)
    w2_bd = jnp.block([[w2, z], [z, w2]]).astype(jnp.bfloat16)           # [256,128]
    b2_bd = jnp.concatenate([params["b_pi2"], params["b_pi2"]], axis=1)  # [1,128]

    # Heads: blockdiag(pi, v) -> [128, n_actions+1]; every column meaningful.
    wh = jnp.zeros((128, head_out), jnp.float32)
    wh = wh.at[:64, :n_actions].set(params["w_pi"])
    wh = wh.at[64:, n_actions:].set(params["w_v"])
    wh = wh.astype(jnp.bfloat16)
    bh = jnp.concatenate([params["b_pi"], params["b_v"]], axis=1)        # [1,head_out]

    return {"w1": w1, "b1": b1, "w2": w2_bd, "b2": b2_bd,
            "wh": wh, "bh": bh, "n_actions": int(n_actions)}


def actor_critics_forward_packed(state, packed, *, tile_b=1024):
    """state: [B, input_dim] float32/bfloat16 -> (pi [B, n_actions], v [B, 1]).

    `state` may be passed as bf16 (halves the input DMA); the kernel casts to
    bf16 for the MXU either way."""
    B, D = state.shape
    n_actions = packed["n_actions"]
    head_out = n_actions + 1
    w1, b1, w2, b2, wh, bh = (packed["w1"], packed["b1"], packed["w2"],
                              packed["b2"], packed["wh"], packed["bh"])

    # ---- batch tiling ----
    b_ceil = _round_up(B, 8)
    tb = max(8, _round_up(min(tile_b, b_ceil), 8))
    # v7x has 2 TensorCores and shards "parallel" grid axes across them; make
    # sure there are >= 2 grid steps when the batch is big enough to split.
    if b_ceil >= 512 and _round_up(b_ceil, tb) // tb < 2:
        tb = max(256, _round_up(-(-b_ceil // 2), 8))
    b_pad = _round_up(b_ceil, tb)
    if b_pad != B:
        state = jnp.pad(state, ((0, b_pad - B), (0, 0)))
    num_tiles = b_pad // tb

    whole = lambda i: (0, 0)          # weights stay VMEM-resident across steps

    in_bytes = state.dtype.itemsize
    cost = pl.CostEstimate(
        flops=2 * b_pad * (D * 256 + 256 * 128 + 128 * head_out),
        transcendentals=0,
        bytes_accessed=(b_pad * D * in_bytes + b_pad * head_out * 4
                        + int(w1.size) * 2 + int(b1.size) * 4
                        + int(w2.size) * 2 + int(b2.size) * 4
                        + int(wh.size) * 2 + int(bh.size) * 4),
    )

    out = pl.pallas_call(
        _actor_critic_kernel,
        out_shape=jax.ShapeDtypeStruct((b_pad, head_out), jnp.float32),
        grid=(num_tiles,),
        in_specs=[
            pl.BlockSpec((tb, D), lambda i: (i, 0)),     # batch tile of states
            pl.BlockSpec(w1.shape, whole),
            pl.BlockSpec(b1.shape, whole),
            pl.BlockSpec(w2.shape, whole),
            pl.BlockSpec(b2.shape, whole),
            pl.BlockSpec(wh.shape, whole),
            pl.BlockSpec(bh.shape, whole),
        ],
        out_specs=pl.BlockSpec((tb, head_out), lambda i: (i, 0)),
        compiler_params=pltpu.CompilerParams(
            dimension_semantics=("parallel",),
            vmem_limit_bytes=32 * 1024 * 1024),
        cost_estimate=cost,
    )(state, w1, b1, w2, b2, wh, bh)

    pi = out[:B, :n_actions]
    v = out[:B, n_actions:head_out]
    return pi, v


def actor_critics_forward(state, params, *, tile_b=1024):
    """Convenience wrapper packing raw params per call. For hot loops, call
    prepare_params() once and use actor_critics_forward_packed()."""
    return actor_critics_forward_packed(state, prepare_params(params),
                                        tile_b=tile_b)


def init_params(key, input_dim, n_actions):
    """Deterministic init mimicking PyTorch nn.Linear default:
    U(-1/sqrt(fan_in), 1/sqrt(fan_in)). Weights stored [in, out]."""
    def linear(key, fan_in, fan_out):
        kw, kb = jax.random.split(key)
        bound = 1.0 / jnp.sqrt(jnp.float32(fan_in))
        w = jax.random.uniform(kw, (fan_in, fan_out), jnp.float32, -bound, bound)
        b = jax.random.uniform(kb, (1, fan_out), jnp.float32, -bound, bound)
        return w, b

    keys = jax.random.split(key, 5)
    w_pi1, b_pi1 = linear(keys[0], input_dim, 128)
    w_v1, b_v1 = linear(keys[1], input_dim, 128)
    w_pi2, b_pi2 = linear(keys[2], 128, 64)
    w_pi, b_pi = linear(keys[3], 64, n_actions)
    w_v, b_v = linear(keys[4], 64, 1)
    return {
        "w_pi1": w_pi1, "b_pi1": b_pi1,
        "w_v1": w_v1, "b_v1": b_v1,
        "w_pi2": w_pi2, "b_pi2": b_pi2,
        "w_pi": w_pi, "b_pi": b_pi,
        "w_v": w_v, "b_v": b_v,
    }


def reference_forward(state, p):
    """Plain-JAX f32 reference of the (quirky) torch forward for verification."""
    pi1 = jnp.maximum(state @ p["w_pi1"] + p["b_pi1"], 0.0)
    v1 = jnp.maximum(state @ p["w_v1"] + p["b_v1"], 0.0)
    pi2 = jnp.maximum(pi1 @ p["w_pi2"] + p["b_pi2"], 0.0)
    v2 = jnp.maximum(v1 @ p["w_pi2"] + p["b_pi2"], 0.0)   # torch reuses pi2
    return pi2 @ p["w_pi"] + p["b_pi"], v2 @ p["w_v"] + p["b_v"]


if __name__ == "__main__":
    key = jax.random.PRNGKey(0)
    k_params, k_state, k_state2 = jax.random.split(key, 3)

    batch = 8
    input_dim = 32      # `input` in the torch module (one-hot state size)
    n_actions = 8

    params = init_params(k_params, input_dim, n_actions)
    packed = prepare_params(params)   # one-time weight packing

    # States in the torch code are one-hot-ish float vectors; any float works.
    state = jax.random.normal(k_state, (batch, input_dim), jnp.float32)
    pi, v = actor_critics_forward_packed(state, packed)
    jax.block_until_ready((pi, v))

    pi_ref, v_ref = reference_forward(state, params)
    assert pi.shape == (batch, n_actions) and v.shape == (batch, 1)
    # bf16 MXU operands -> relaxed tolerance vs. the f32 reference.
    assert jnp.allclose(pi, pi_ref, atol=3e-2, rtol=3e-2)
    assert jnp.allclose(v, v_ref, atol=3e-2, rtol=3e-2)

    # Second check: non-multiple-of-tile batch, multi-step grid (exercises
    # batch padding and the batch-parallel grid axis).
    state2 = jax.random.normal(k_state2, (80, input_dim), jnp.float32)
    pi2, v2 = actor_critics_forward_packed(state2, packed, tile_b=32)
    jax.block_until_ready((pi2, v2))
    pi2_ref, v2_ref = reference_forward(state2, params)
    assert pi2.shape == (80, n_actions) and v2.shape == (80, 1)
    assert jnp.allclose(pi2, pi2_ref, atol=3e-2, rtol=3e-2)
    assert jnp.allclose(v2, v2_ref, atol=3e-2, rtol=3e-2)

    print("KERNEL_OK")
</pallas_src>

<mosaic_0001>
module attributes {stable_mosaic.version = 11 : i64} {
  func.func @_actor_critic_kernel(%arg0: i32, %arg1: memref<8x32xf32, #tpu.memory_space<vmem>>, %arg2: memref<32x256xbf16, #tpu.memory_space<vmem>>, %arg3: memref<1x256xf32, #tpu.memory_space<vmem>>, %arg4: memref<256x128xbf16, #tpu.memory_space<vmem>>, %arg5: memref<1x128xf32, #tpu.memory_space<vmem>>, %arg6: memref<128x9xbf16, #tpu.memory_space<vmem>>, %arg7: memref<1x9xf32, #tpu.memory_space<vmem>>, %arg8: memref<8x9xf32, #tpu.memory_space<vmem>>) attributes {dimension_semantics = [#tpu.dimension_semantics<parallel>], iteration_bounds = array<i64: 1>, scalar_prefetch = 0 : i64, scratch_operands = 0 : i64, tpu.core_type = #tpu.core_type<tc>, window_params = [{transform_indices = @transform_0, window_bounds = array<i64: 8, 32>}, {pipeline_mode = #tpu.pipeline_mode<synchronous>, transform_indices = @transform_1, window_bounds = array<i64: 32, 256>}, {pipeline_mode = #tpu.pipeline_mode<synchronous>, transform_indices = @transform_2, window_bounds = array<i64: 1, 256>}, {pipeline_mode = #tpu.pipeline_mode<synchronous>, transform_indices = @transform_3, window_bounds = array<i64: 256, 128>}, {pipeline_mode = #tpu.pipeline_mode<synchronous>, transform_indices = @transform_4, window_bounds = array<i64: 1, 128>}, {pipeline_mode = #tpu.pipeline_mode<synchronous>, transform_indices = @transform_5, window_bounds = array<i64: 128, 9>}, {pipeline_mode = #tpu.pipeline_mode<synchronous>, transform_indices = @transform_6, window_bounds = array<i64: 1, 9>}, {transform_indices = @transform_7, window_bounds = array<i64: 8, 9>}]} {
    %c0 = arith.constant 0 : index
    %c0_0 = arith.constant 0 : index
    %0 = vector.load %arg1[%c0, %c0_0] : memref<8x32xf32, #tpu.memory_space<vmem>>, vector<8x32xf32>
    %1 = arith.truncf %0 : vector<8x32xf32> to vector<8x32xbf16>
    %c0_1 = arith.constant 0 : index
    %c0_2 = arith.constant 0 : index
    %2 = vector.load %arg2[%c0_1, %c0_2] : memref<32x256xbf16, #tpu.memory_space<vmem>>, vector<32x256xbf16>
    %cst = arith.constant dense<0.000000e+00> : vector<8x256xf32>
    %3 = tpu.matmul %1, %2, %cst {dimension_numbers = #tpu.dot_dimension_numbers<[1], [0], [0], [1], [0, 0, 1, 1], [], []>} : vector<8x32xbf16>, vector<32x256xbf16>, vector<8x256xf32> -> vector<8x256xf32>
    %c0_3 = arith.constant 0 : index
    %c0_4 = arith.constant 0 : index
    %4 = vector.load %arg3[%c0_3, %c0_4] : memref<1x256xf32, #tpu.memory_space<vmem>>, vector<1x256xf32>
    %5 = vector.broadcast %4 : vector<1x256xf32> to vector<8x256xf32>
    %6 = arith.addf %3, %5 : vector<8x256xf32>
    %cst_5 = arith.constant 0.000000e+00 : f32
    %7 = vector.broadcast %cst_5 : f32 to vector<8x256xf32>
    %8 = arith.maximumf %6, %7 : vector<8x256xf32>
    %9 = arith.truncf %8 : vector<8x256xf32> to vector<8x256xbf16>
    %c0_6 = arith.constant 0 : index
    %c0_7 = arith.constant 0 : index
    %10 = vector.load %arg4[%c0_6, %c0_7] : memref<256x128xbf16, #tpu.memory_space<vmem>>, vector<256x128xbf16>
    %cst_8 = arith.constant dense<0.000000e+00> : vector<8x128xf32>
    %11 = tpu.matmul %9, %10, %cst_8 {dimension_numbers = #tpu.dot_dimension_numbers<[1], [0], [0], [1], [0, 0, 1, 1], [], []>} : vector<8x256xbf16>, vector<256x128xbf16>, vector<8x128xf32> -> vector<8x128xf32>
    %c0_9 = arith.constant 0 : index
    %c0_10 = arith.constant 0 : index
    %12 = vector.load %arg5[%c0_9, %c0_10] : memref<1x128xf32, #tpu.memory_space<vmem>>, vector<1x128xf32>
    %13 = vector.broadcast %12 : vector<1x128xf32> to vector<8x128xf32>
    %14 = arith.addf %11, %13 : vector<8x128xf32>
    %cst_11 = arith.constant 0.000000e+00 : f32
    %15 = vector.broadcast %cst_11 : f32 to vector<8x128xf32>
    %16 = arith.maximumf %14, %15 : vector<8x128xf32>
    %17 = arith.truncf %16 : vector<8x128xf32> to vector<8x128xbf16>
    %c0_12 = arith.constant 0 : index
    %c0_13 = arith.constant 0 : index
    %18 = vector.load %arg6[%c0_12, %c0_13] : memref<128x9xbf16, #tpu.memory_space<vmem>>, vector<128x9xbf16>
    %cst_14 = arith.constant dense<0.000000e+00> : vector<8x9xf32>
    %19 = tpu.matmul %17, %18, %cst_14 {dimension_numbers = #tpu.dot_dimension_numbers<[1], [0], [0], [1], [0, 0, 1, 1], [], []>} : vector<8x128xbf16>, vector<128x9xbf16>, vector<8x9xf32> -> vector<8x9xf32>
    %c0_15 = arith.constant 0 : index
    %c0_16 = arith.constant 0 : index
    %20 = vector.load %arg7[%c0_15, %c0_16] : memref<1x9xf32, #tpu.memory_space<vmem>>, vector<1x9xf32>
    %21 = vector.broadcast %20 : vector<1x9xf32> to vector<8x9xf32>
    %22 = arith.addf %19, %21 : vector<8x9xf32>
    %c0_17 = arith.constant 0 : index
    %c0_18 = arith.constant 0 : index
    %23 = vector.load %arg8[%c0_17, %c0_18] : memref<8x9xf32, #tpu.memory_space<vmem>>, vector<8x9xf32>
    tpu.vector_store %arg8[%c0_17, %c0_18], %22 {strides = array<i32>} : memref<8x9xf32, #tpu.memory_space<vmem>>, vector<8x9xf32>,
    return
  }
  func.func @transform_0(%arg0: i32) -> (i32, i32) {
    %c0_i32 = arith.constant 0 : i32
    %c0_i32_0 = arith.constant 0 : i32
    return %arg0, %c0_i32 : i32, i32
  }
  func.func @transform_1(%arg0: i32) -> (i32, i32) {
    %c0_i32 = arith.constant 0 : i32
    %c0_i32_0 = arith.constant 0 : i32
    %c0_i32_1 = arith.constant 0 : i32
    return %c0_i32, %c0_i32_0 : i32, i32
  }
  func.func @transform_2(%arg0: i32) -> (i32, i32) {
    %c0_i32 = arith.constant 0 : i32
    %c0_i32_0 = arith.constant 0 : i32
    %c0_i32_1 = arith.constant 0 : i32
    return %c0_i32, %c0_i32_0 : i32, i32
  }
  func.func @transform_3(%arg0: i32) -> (i32, i32) {
    %c0_i32 = arith.constant 0 : i32
    %c0_i32_0 = arith.constant 0 : i32
    %c0_i32_1 = arith.constant 0 : i32
    return %c0_i32, %c0_i32_0 : i32, i32
  }
  func.func @transform_4(%arg0: i32) -> (i32, i32) {
    %c0_i32 = arith.constant 0 : i32
    %c0_i32_0 = arith.constant 0 : i32
    %c0_i32_1 = arith.constant 0 : i32
    return %c0_i32, %c0_i32_0 : i32, i32
  }
  func.func @transform_5(%arg0: i32) -> (i32, i32) {
    %c0_i32 = arith.constant 0 : i32
    %c0_i32_0 = arith.constant 0 : i32
    %c0_i32_1 = arith.constant 0 : i32
    return %c0_i32, %c0_i32_0 : i32, i32
  }
  func.func @transform_6(%arg0: i32) -> (i32, i32) {
    %c0_i32 = arith.constant 0 : i32
    %c0_i32_0 = arith.constant 0 : i32
    %c0_i32_1 = arith.constant 0 : i32
    return %c0_i32, %c0_i32_0 : i32, i32
  }
  func.func @transform_7(%arg0: i32) -> (i32, i32) {
    %c0_i32 = arith.constant 0 : i32
    %c0_i32_0 = arith.constant 0 : i32
    return %arg0, %c0_i32 : i32, i32
  }
}

</mosaic_0001>

<bundles_post_ra>
// kernel: tpu_custom_call.1
= control target key start
LH: loop header
LB: loop body
LE: loop exit
PB: predicated region body
PF: predicated region fallthrough
CT: control target
= control target key end

     0   :  { %12 = vsyncpa [#allocation3], 0  ;;  %s720_s0 = inlined_call_operand.vmem [shape: f32[8,32], index: 0, kind: input, shape index: {}]   ;;  %s721_s1 = inlined_call_operand.vmem [shape: bf16[32,256], index: 1, kind: input, shape index: {}]   ;;  %s722_s2 = inlined_call_operand.vmem [shape: f32[1,256], index: 2, kind: input, shape index: {}]   ;;  %s723_s3 = inlined_call_operand.hbm [shape: bf16[256,128], index: 3, kind: input, shape index: {}]   ;;  %s724_s4 = inlined_call_operand.vmem [shape: f32[1,128], index: 4, kind: input, shape index: {}]   ;;  %s725_s5 = inlined_call_operand.vmem [shape: bf16[128,9], index: 5, kind: input, shape index: {}]   ;;  %s726_s6 = inlined_call_operand.vmem [shape: f32[1,9], index: 6, kind: input, shape index: {}]   ;;  %s727_s7 = inlined_call_operand.hbm [shape: f32[8,9], index: 7, kind: output, shape index: {}]  }
   0x1   :  { %13 = vsyncpa [#allocation4], 0  ;;  %s601_s24 = smov [#allocation2]   ;;  %s553_s28 = scalar_lea.hbm %s723_s3, 2048 }
   0x2   :  { %s25_s25 = sshll.u32 %s601_s24, 4  ;;  %p554_p0 = scmp.ne.s32.totalorder %s723_s3, %s553_s28  ;;  %s26_s25 = int_to_ptr.vmem [resolvable:$true] %s25_s25 }
   0x3   :  { %p557_p1 = scmp.lt.u32.totalorder %s553_s28, %s723_s3 }
   0x5   :  { %p559_p2 = pnand %p557_p1, %p554_p0 }
   0x7   :  { %562 = shalt.err (!%p559_p2)
}
   0x8   :  { %s563_s10 = scalar_lea.vmem %s26_s25, 2048  ;;  %p568_p4 = scmp.lt.s32.totalorder %s26_s25, %s26_s25 }
   0x9   :  { %p564_p3 = scmp.ne.s32.totalorder %s26_s25, %s563_s10  ;;  %p569_p5 = scmp.lt.s32.totalorder %s563_s10, %s563_s10 }
   0xb   :  { %p570_p6 = por %p569_p5, %p568_p4 }
   0xd   :  { %p571_p7 = pnand %p570_p6, %p564_p3 }
   0xf   :  { %574 = shalt.err (!%p571_p7)
}
  0x10   :  { %s602_s11 = smov 64   ;;  %s603_s12 = smov 4  }
  0x11   :  { %31 = dma.hbm_to_vmem [thread:$0]  %s723_s3, 2048, %s26_s25, [#allocation3], %s602_s11, %s602_s11, %s603_s12  }
  0x12   :  { %597 = dma.done.wait [#allocation3], 2048  }
  0x13   :  { %598 = vsyncadd [#allocation3], 4294965248  ;;  %v604_v0 = vmov 0   ;;  %v523_v1 = vld [vmem:[%s721_s1 + $0x4] ss:$8 sps:$4 sm:$0xff]   ;;  %vm80_vm0 = vcmask 261120   ;;  %v50_v30 = vlaneseq }
  0x14   :  { %116 = vmatprep.mubr.bf16.mxu0 %v604_v0  ;;  %v525_v2 = vld [vmem:[%s721_s1] ss:$8 sps:$4 sm:$0xff]   ;;  %84 = vmatprep.subr.bf16.mxu0 %v523_v1  ;;  %v526_v3 = vld [vmem:[%s721_s1 + $0x14] ss:$8 sps:$4 sm:$0xff]   ;;  %v528_v4 = vld [vmem:[%s721_s1 + $0x10] ss:$8 sps:$4 sm:$0xff]  }
  0x15   :  { %v42_v5 = vld [vmem:[%s720_s0] sm:$0xff]  ;;  %85 = vmatpush1.bf16.msra.mxu0 %v525_v2  ;;  %v531_v8 = vld [vmem:[#allocation2 + $0x48] sm:$0xff]   ;;  %v533_v11 = vld [vmem:[#allocation2 + $0x50] sm:$0xff]   ;;  %v605_v24 = vmov 0.0   ;;  %v51_v31 = vshrl.u32 %v50_v30, 7  ;;  %vm606_vm1 = vmmov 0  }
  0x16   :  { %v529_v6 = vld [vmem:[#allocation2 + $0x40] sm:$0xff]   ;;  %86 = vmatprep.subr.bf16.mxu0 %v526_v3  ;;  %v43_v9 = vpack.c.bf16 %v42_v5, %v42_v5  ;;  %v532_v10 = vld [vmem:[#allocation2 + $0x8] sm:$0xff]   ;;  %v534_v12 = vld [vmem:[#allocation2 + $0x10] sm:$0xff]   ;;  %vm417_vm2 = vcmask 72704  }
  0x17   :  { %v530_v7 = vld [vmem:[#allocation2] sm:$0xff]   ;;  %465 = vmatprep.subr.bf16.mxu1 %v529_v6  ;;  %v535_v13 = vld [vmem:[#allocation2 + $0x58] sm:$0xff]   ;;  %v539_v17 = vld [vmem:[#allocation2 + $0x68] sm:$0xff]   ;;  %v52_v32 = vsub.s32 0, %v51_v31  ;;  %v56_v34 = vsub.s32 1, %v51_v31 }
  0x18   :  { %466 = vmatpush3.bf16.msra.mxu1 %v530_v7  ;;  %v536_v14 = vld [vmem:[#allocation2 + $0x18] sm:$0xff]   ;;  %v537_v15 = vld [vmem:[#allocation2 + $0x60] sm:$0xff]   ;;  %v540_v18 = vld [vmem:[#allocation2 + $0x28] sm:$0xff]  }
  0x19   :  { %87 = vmatpush1.bf16.msra.mxu0 %v528_v4  ;;  %467 = vmatprep.subr.bf16.mxu1 %v531_v8  ;;  %v538_v16 = vld [vmem:[#allocation2 + $0x20] sm:$0xff]   ;;  %v541_v19 = vld [vmem:[#allocation2 + $0x70] sm:$0xff]   ;;  %v543_v21 = vld [vmem:[#allocation2 + $0x78] sm:$0xff]  }
  0x1a   :  { %v542_v20 = vld [vmem:[#allocation2 + $0x30] sm:$0xff]   ;;  %v544_v22 = vld [vmem:[#allocation2 + $0x38] sm:$0xff]   ;;  %v545_v23 = vld [vmem:[%s725_s5] sm:$0xff]   ;;  %496 = vmatprep.subr.bf16.mxu0 %v605_v24 }
  0x1b   :  { %v546_v25 = vld [vmem:[%s725_s5 + $0x8] sm:$0xff]   ;;  %v547_v26 = vld [vmem:[%s725_s5 + $0x10] sm:$0xff]   ;;  %v548_v27 = vld [vmem:[%s725_s5 + $0x18] sm:$0xff]  }
  0x1c   :  { %438 = vmatmul.mubr.msk.bf16.vlgmr.msra.gmra.mrb[0].mxu0 %vm80_vm0, %v43_v9  ;;  %468 = vmatpush3.bf16.msra.mxu1 %v532_v10  ;;  %v549_v28 = vld [vmem:[%s725_s5 + $0x20] sm:$0xff]   ;;  %v550_v29 = vld [vmem:[%s725_s5 + $0x28] sm:$0xff]   ;;  %v551_v47 = vld [vmem:[%s725_s5 + $0x30] sm:$0xff]  }
  0x1d   :  { %469 = vmatprep.subr.bf16.mxu1 %v533_v11  ;;  %497 = vmatpush3.bf16.msra.mxu0 %v545_v23  ;;  %v48_v33 = vld [vmem:[%s722_s2] sm:$0x3]  ;;  %v552_v48 = vld [vmem:[%s725_s5 + $0x38] sm:$0xff]   ;;  %s607_s5 = smov [#allocation5]  }
  0x1e   :  { %498 = vmatprep.subr.bf16.mxu0 %v605_v24  ;;  %v53_v35 = vrot.slane %v48_v33, %v52_v32  ;;  %v57_v36 = vrot.slane %v48_v33, %v56_v34  ;;  %512 = vmatprep.mubr.msk.bf16.mxu0 %vm606_vm1, %v605_v24  ;;  %v439_v50 = vld [vmem:[%s724_s4] ss:$0 sm:$0xff]  ;;  %s425_s20 = sshll.u32 %s607_s5, 4  ;;  %s426_s20 = int_to_ptr.vmem [resolvable:$true] %s425_s20 }
  0x1f   :  { %v456_v58 = vld [vmem:[%s726_s6] ss:$0 sm:$0xff]  ;;  %s575_s4 = scalar_lea.vmem %s426_s20, 128  ;;  %p580_p9 = scmp.lt.s32.totalorder %s426_s20, %s426_s20 }
  0x20   :  { %470 = vmatpush3.bf16.msra.mxu1 %v534_v12  ;;  %p576_p8 = scmp.ne.s32.totalorder %s426_s20, %s575_s4  ;;  %p581_p10 = scmp.lt.s32.totalorder %s575_s4, %s575_s4 }
  0x21   :  { %471 = vmatprep.subr.bf16.mxu1 %v535_v13  ;;  %499 = vmatpush3.bf16.msra.mxu0 %v546_v25 }
  0x22   :  { %500 = vmatprep.subr.bf16.mxu0 %v605_v24  ;;  %p582_p11 = por %p581_p10, %p580_p9 }
  0x24   :  { %472 = vmatpush3.bf16.msra.mxu1 %v536_v14  ;;  %p583_p12 = pnand %p582_p11, %p576_p8 }
  0x25   :  { %473 = vmatprep.subr.bf16.mxu1 %v537_v15  ;;  %501 = vmatpush3.bf16.msra.mxu0 %v547_v26 }
  0x26   :  { %502 = vmatprep.subr.bf16.mxu0 %v605_v24 }
  0x28   :  { %474 = vmatpush3.bf16.msra.mxu1 %v538_v16 }
  0x29   :  { %475 = vmatprep.subr.bf16.mxu1 %v539_v17  ;;  %503 = vmatpush3.bf16.msra.mxu0 %v548_v27 }
  0x2a   :  { %504 = vmatprep.subr.bf16.mxu0 %v605_v24 }
  0x2c   :  { %476 = vmatpush3.bf16.msra.mxu1 %v540_v18 }
  0x2d   :  { %477 = vmatprep.subr.bf16.mxu1 %v541_v19  ;;  %505 = vmatpush3.bf16.msra.mxu0 %v549_v28 }
  0x2e   :  { %506 = vmatprep.subr.bf16.mxu0 %v605_v24 }
  0x30   :  { %478 = vmatpush3.bf16.msra.mxu1 %v542_v20 }
  0x31   :  { %479 = vmatprep.subr.bf16.mxu1 %v543_v21  ;;  %507 = vmatpush3.bf16.msra.mxu0 %v550_v29 }
  0x32   :  { %508 = vmatprep.subr.bf16.mxu0 %v605_v24 }
  0x34   :  { %480 = vmatpush3.bf16.msra.mxu1 %v544_v22 }
  0x35   :  { %509 = vmatpush3.bf16.msra.mxu0 %v551_v47 }
  0x36   :  { %510 = vmatprep.subr.bf16.mxu0 %v605_v24 }
  0x39   :  { %511 = vmatpush3.bf16.msra.mxu0 %v552_v48 }
  0xef   :  { %v118_v37 = vpop.f32.mrb[0].mxu0 }
  0xf0   :  { %v119_v38 = vadd.f32 %v118_v37, %v53_v35  ;;  %v120_v39 = vpop.f32.mrb[1].mxu0 }
  0xf1   :  { %v121_v40 = vadd.f32 %v120_v39, %v57_v36  ;;  %v122_v41 = vpop.f32.mrb[2].mxu0 }
  0xf2   :  { %v125_v42 = vmax.f32 %v119_v38, 0.0  ;;  %v123_v43 = vpop.f32.mrb[3].mxu0 }
  0xf3   :  { %v126_v44 = vmax.f32 %v121_v40, 0.0 }
  0xf4   :  { %v127_v46 = vpack.c.bf16 %v125_v42, %v125_v42 }
  0xf5   :  { %v128_v45 = vpack.c.bf16 %v126_v44, %v126_v44 }
  0xf7   :  { %296 = vmatprep.mubr.bf16.mxu1 %v128_v45 }
  0xf8   :  { %297 = vmatmul.mubr.bf16.vlgmr.msra.gmra.mrb[0].mxu1 %v127_v46 }
 0x1cb   :  { %v481_v49 = vpop.f32.mrb[0].mxu1 }
 0x1cc   :  { %v482_v51 = vpop.f32.mrb[1].mxu1 }
 0x1cd   :  { %v483_v52 = vadd.f32 %v482_v51, %v481_v49  ;;  %v484_v53 = vpop.f32.mrb[2].mxu1 }
 0x1ce   :  { %v485_v54 = vpop.f32.mrb[3].mxu1 }
 0x1cf   :  { %v299_v55 = vadd.f32 %v483_v52, %v439_v50 }
 0x1d1   :  { %v304_v56 = vmax.f32 %v299_v55, 0.0 }
 0x1d3   :  { %v305_v57 = vpack.c.bf16 %v304_v56, %v304_v56 }
 0x1d5   :  { %513 = vmatmul.mubr.bf16.vlgmr.msra.gmra.mrb[4].mxu0 %v305_v57 }
 0x2a8   :  { %v411_v59 = vpop.f32.mrb[4].mxu0 }
 0x2a9   :  { %v412_v60 = vadd.f32 %v456_v58, %v411_v59  ;;  %v514_v61 = vpop.f32.mrb[5].mxu0 }
 0x2aa   :  { %v414_v62 = vpop.f32.mrb[6].mxu0 }
 0x2ab   :  { %v515_v63 = vpop.f32.mrb[7].mxu0  ;;  %418 = vst.msk [vmem:[#allocation5] sm:$0xff] %vm417_vm2, %v412_v60 }
 0x2ac   :  { %586 = shalt.err (!%p583_p12)
}
 0x2ad   :  { %s587_s6 = scalar_lea.hbm %s727_s7, 128 }
 0x2ae   :  { %p588_p13 = scmp.ne.s32.totalorder %s727_s7, %s587_s6  ;;  %p591_p0 = scmp.lt.u32.totalorder %s587_s6, %s727_s7 }
 0x2b0   :  { %p593_p1 = pnand %p591_p0, %p588_p13 }
 0x2b2   :  { %596 = shalt.err (!%p593_p1)
}
 0x2b3   :  { %428 = dma.vmem_to_hbm [thread:$0]  %s426_s20, 128, %s727_s7, [#allocation4]  }
 0x2b4   :  { %599 = dma.done.wait [#allocation4], 128  }
 0x2b5   :  { %600 = vsyncadd [#allocation4], 4294967168 }
 0x2b6   :  { %432 = vsyncpa [#allocation3], 1 }
 0x2b7   :  { %433 = vsyncpa [#allocation4], 1 }

</bundles_post_ra>
